<compile_context>
chip_gen: v7x
topology: tpu7x:2x2x1
jax: 0.10.0
libtpu: 0.0.40
codegen_flags: <defaults>
</compile_context>

<pallas_src>
import functools

import jax
import jax.numpy as jnp
from jax.experimental import pallas as pl
from jax.experimental.pallas import tpu as pltpu

EPS = 1e-5


# ----------------------------------------------------------------------------
# Helpers
# ----------------------------------------------------------------------------
def _vmem_limit_bytes():
    """Per-generation scoped-VMEM budget: ~3/4 of physical, capped at 112 MiB."""
    try:
        cap = int(pltpu.get_tpu_info().vmem_capacity_bytes)
    except Exception:
        return 32 * 1024 * 1024  # conservative fallback, safe on all generations
    return min((cap * 3) // 4, 112 * 1024 * 1024)


def _img_spec(*tail):
    """One image per grid step: block (None, *tail), index (b, 0, ...)."""
    n = len(tail)
    return pl.BlockSpec((None,) + tuple(tail), lambda b, _n=n: (b,) + (0,) * _n)


def _const_spec(*shape):
    """Grid-invariant operand resident across all steps (single-buffered)."""
    n = len(shape)
    idx = lambda b, _n=n: (0,) * _n
    try:
        return pl.BlockSpec(tuple(shape), idx, pipeline_mode=pl.Buffered(1))
    except Exception:  # older jax without pipeline_mode support
        return pl.BlockSpec(tuple(shape), idx)


def _conv3x3(x, wg_ref, rows, mcol, width):
    """3x3 'SAME' conv of one (C, P=H*W) image tile as 3 lane-dense MXU matmuls.

    x      : (C, P) activation tile (pixels on lanes).
    wg_ref : (3, Cout, 3*C) weights grouped by kernel column kx; columns of each
             group are ky-major / input-channel-minor.
    rows   : VMEM scratch (3*C, P) in compute dtype; filled with the ky=-1/0/+1
             row-shifted copies of x (explicit zero rows = vertical padding).
    mcol   : (2, P) f32 masks [col >= 1, col <= W-2] (horizontal padding).
    """
    C, P = x.shape
    cdt = wg_ref.dtype
    xc = x.astype(cdt)
    zrow = jnp.zeros((C, width), cdt)

    # Row-shifted stack written straight into VMEM scratch (no concat/reshape).
    rows[0:C, 0:width] = zrow                        # ky=0 : row h-1 (top pad)
    rows[0:C, width:P] = xc[:, 0:P - width]
    rows[C:2 * C, :] = xc                            # ky=1 : row h
    rows[2 * C:3 * C, 0:P - width] = xc[:, width:P]  # ky=2 : row h+1 (bottom pad)
    rows[2 * C:3 * C, P - width:P] = zrow
    r = rows[...]

    z0 = jnp.dot(wg_ref[0], r, preferred_element_type=jnp.float32)  # kx=0 (left)
    z1 = jnp.dot(wg_ref[1], r, preferred_element_type=jnp.float32)  # kx=1 (center)
    z2 = jnp.dot(wg_ref[2], r, preferred_element_type=jnp.float32)  # kx=2 (right)

    co = z0.shape[0]
    zc = jnp.zeros((co, 1), jnp.float32)
    left = jnp.concatenate([zc, z0[:, :P - 1]], axis=1) * mcol[0:1, :]
    right = jnp.concatenate([z2[:, 1:], zc], axis=1) * mcol[1:2, :]
    return z1 + left + right


# ----------------------------------------------------------------------------
# Pass A: conv1 (3x3) raw output + BN1/BN3 batch statistics (1x1 not stored)
# ----------------------------------------------------------------------------
def _kernel_a(x_ref, w1_ref, wid_ref, bias_ref, msk_ref, y1_ref, stats_ref, rows,
              *, width):
    cdt = w1_ref.dtype
    xc = x_ref[...].astype(cdt)            # (Cin, P)
    m = msk_ref[...]                       # (2, P) column masks

    # conv1 (3x3), raw pre-BN output, f32 accumulation.
    y1 = _conv3x3(xc, w1_ref, rows, m, width) + bias_ref[:, 0:1]

    # 1x1 residual conv: computed only for its BN3 statistics here; it is
    # recomputed (one tiny matmul) in pass C instead of round-tripping HBM.
    idn = jnp.dot(wid_ref[...], xc, preferred_element_type=jnp.float32)
    idn = idn + bias_ref[:, 1:2]

    # Per-image sum / sum-of-squares -> reduced over the batch in the wrapper,
    # so the batch grid axis stays fully 'parallel' (no shared accumulator).
    stats_ref[...] = jnp.concatenate(
        [jnp.sum(y1, axis=1, keepdims=True),
         jnp.sum(y1 * y1, axis=1, keepdims=True),
         jnp.sum(idn, axis=1, keepdims=True),
         jnp.sum(idn * idn, axis=1, keepdims=True)], axis=1)

    y1_ref[...] = y1.astype(y1_ref.dtype)


# ----------------------------------------------------------------------------
# Pass B: BN1 (folded affine) + ReLU + conv2 (3x3) raw output + BN2 statistics
# ----------------------------------------------------------------------------
def _kernel_b(y1_ref, w2_ref, aff_ref, msk_ref, y2_ref, stats_ref, rows, *, width):
    m = msk_ref[...]
    s1 = aff_ref[:, 0:1]
    sh1 = aff_ref[:, 1:2]
    b2 = aff_ref[:, 2:3]

    r = jnp.maximum(y1_ref[...].astype(jnp.float32) * s1 + sh1, 0.0)  # BN1 + ReLU
    y2 = _conv3x3(r, w2_ref, rows, m, width) + b2

    stats_ref[...] = jnp.concatenate(
        [jnp.sum(y2, axis=1, keepdims=True),
         jnp.sum(y2 * y2, axis=1, keepdims=True)], axis=1)

    y2_ref[...] = y2.astype(y2_ref.dtype)


# ----------------------------------------------------------------------------
# Pass C: BN2 + BN3(recomputed 1x1) + residual add + ReLU  (aliased onto y2)
# ----------------------------------------------------------------------------
def _kernel_c(y2_ref, x_ref, wid_ref, aff_ref, o_ref):
    s2 = aff_ref[:, 0:1]
    shift = aff_ref[:, 1:2]
    # BN3-folded 1x1 residual conv, recomputed from x (never stored in HBM).
    idn = jnp.dot(wid_ref[...], x_ref[...].astype(wid_ref.dtype),
                  preferred_element_type=jnp.float32)
    o_ref[...] = jnp.maximum(
        y2_ref[...].astype(jnp.float32) * s2 + idn + shift, 0.0
    ).astype(o_ref.dtype)


# ----------------------------------------------------------------------------
# Wrapper
# ----------------------------------------------------------------------------
def conv_block(x_nchw, params, compute_dtype=jnp.bfloat16):
    """ConvBlock forward. x_nchw: (B, Cin, H, W) -> (B, Cout, H, W) (res=True)."""
    B, Cin, H, W = x_nchw.shape
    Cout = params["w1"].shape[0]
    P = H * W
    inter_dtype = compute_dtype  # dtype of the HBM intermediates y1 / y2 / out

    x = x_nchw.reshape(B, Cin, P).astype(jnp.float32)  # flattened NCHW == (C, HW)

    # Weights grouped by kernel column kx: (3, Cout, 3*Cin), ky-major / ci-minor.
    def _group3x3(w):
        co, ci = w.shape[0], w.shape[1]
        return jnp.transpose(w, (3, 0, 2, 1)).reshape(3, co, 3 * ci)

    w1g = _group3x3(params["w1"]).astype(compute_dtype)
    w2g = _group3x3(params["w2"]).astype(compute_dtype)
    wid = params["wid"].reshape(Cout, Cin)
    bias_a = jnp.stack([params["b1"], params["bid"]], axis=1).astype(jnp.float32)

    col = jnp.arange(P, dtype=jnp.int32) % W
    masks = jnp.stack([(col >= 1), (col <= W - 2)]).astype(jnp.float32)  # (2, P)

    cp = pltpu.CompilerParams(dimension_semantics=("parallel",),
                              vmem_limit_bytes=_vmem_limit_bytes())

    # ---- pass A: conv1 raw output + BN1/BN3 statistics ---------------------
    y1, stats_a = pl.pallas_call(
        functools.partial(_kernel_a, width=W),
        grid=(B,),
        in_specs=[_img_spec(Cin, P),
                  _const_spec(3, Cout, 3 * Cin),
                  _const_spec(Cout, Cin),
                  _const_spec(Cout, 2),
                  _const_spec(2, P)],
        out_specs=[_img_spec(Cout, P), _img_spec(Cout, 4)],
        out_shape=(jax.ShapeDtypeStruct((B, Cout, P), inter_dtype),
                   jax.ShapeDtypeStruct((B, Cout, 4), jnp.float32)),
        scratch_shapes=[pltpu.VMEM((3 * Cin, P), compute_dtype)],
        compiler_params=cp,
    )(x, w1g, wid.astype(compute_dtype), bias_a, masks)

    # Fold training-mode BN (batch stats, biased var, clamped) into scale/shift.
    n_elem = float(B * P)

    def _affine(s, q, gamma, beta):
        mean = s / n_elem
        var = jnp.maximum(q / n_elem - mean * mean, 0.0)
        scale = gamma * jax.lax.rsqrt(var + EPS)
        return scale, beta - mean * scale

    sa = jnp.sum(stats_a, axis=0)                      # (Cout, 4)
    s1, sh1 = _affine(sa[:, 0], sa[:, 1], params["g1"], params["be1"])
    s3, sh3 = _affine(sa[:, 2], sa[:, 3], params["g3"], params["be3"])
    aff_b = jnp.stack([s1, sh1, params["b2"]], axis=1).astype(jnp.float32)

    # ---- pass B: BN1 + ReLU + conv2 raw output + BN2 statistics ------------
    y2, stats_b = pl.pallas_call(
        functools.partial(_kernel_b, width=W),
        grid=(B,),
        in_specs=[_img_spec(Cout, P),
                  _const_spec(3, Cout, 3 * Cout),
                  _const_spec(Cout, 3),
                  _const_spec(2, P)],
        out_specs=[_img_spec(Cout, P), _img_spec(Cout, 2)],
        out_shape=(jax.ShapeDtypeStruct((B, Cout, P), inter_dtype),
                   jax.ShapeDtypeStruct((B, Cout, 2), jnp.float32)),
        scratch_shapes=[pltpu.VMEM((3 * Cout, P), compute_dtype)],
        compiler_params=cp,
    )(y1, w2g, aff_b, masks)

    sb = jnp.sum(stats_b, axis=0)
    s2, sh2 = _affine(sb[:, 0], sb[:, 1], params["g2"], params["be2"])
    # Fold BN3 scale into the 1x1 weights; fold BN3(bias) + BN2 shift together.
    wid_s = (s3[:, None] * wid).astype(compute_dtype)
    aff_c = jnp.stack([s2, sh2 + sh3 + s3 * params["bid"]], axis=1).astype(jnp.float32)

    # ---- pass C: BN2 + BN3(1x1 recompute) + add + ReLU, output aliases y2 --
    out = pl.pallas_call(
        _kernel_c,
        grid=(B,),
        in_specs=[_img_spec(Cout, P), _img_spec(Cin, P),
                  _const_spec(Cout, Cin), _const_spec(Cout, 2)],
        out_specs=_img_spec(Cout, P),
        out_shape=jax.ShapeDtypeStruct((B, Cout, P), inter_dtype),
        input_output_aliases={0: 0},
        compiler_params=cp,
    )(y2, x, wid_s, aff_c)

    return out.reshape(B, Cout, H, W)


# ----------------------------------------------------------------------------
# Params (PyTorch shapes) + pure-JAX reference
# ----------------------------------------------------------------------------
def init_params(key, cin, cout):
    ks = jax.random.split(key, 12)
    n = jax.random.normal
    return dict(
        w1=n(ks[0], (cout, cin, 3, 3), jnp.float32) * 0.1,
        b1=n(ks[1], (cout,), jnp.float32) * 0.1,
        w2=n(ks[2], (cout, cout, 3, 3), jnp.float32) * 0.1,
        b2=n(ks[3], (cout,), jnp.float32) * 0.1,
        wid=n(ks[4], (cout, cin, 1, 1), jnp.float32) * 0.1,
        bid=n(ks[5], (cout,), jnp.float32) * 0.1,
        g1=1.0 + 0.1 * n(ks[6], (cout,), jnp.float32),
        be1=0.1 * n(ks[7], (cout,), jnp.float32),
        g2=1.0 + 0.1 * n(ks[8], (cout,), jnp.float32),
        be2=0.1 * n(ks[9], (cout,), jnp.float32),
        g3=1.0 + 0.1 * n(ks[10], (cout,), jnp.float32),
        be3=0.1 * n(ks[11], (cout,), jnp.float32),
    )


def ref_conv_block(x, p):
    """Pure-JAX (lax.conv, NCHW, f32) reference of the PyTorch forward (res=True)."""
    def conv(v, w, b):
        y = jax.lax.conv_general_dilated(
            v, w, (1, 1), "SAME", dimension_numbers=("NCHW", "OIHW", "NCHW"))
        return y + b.reshape(1, -1, 1, 1)

    def bn(v, g, be):
        mean = jnp.mean(v, axis=(0, 2, 3), keepdims=True)
        var = jnp.mean((v - mean) ** 2, axis=(0, 2, 3), keepdims=True)
        return ((v - mean) / jnp.sqrt(var + EPS)) * g.reshape(1, -1, 1, 1) \
            + be.reshape(1, -1, 1, 1)

    c = bn(conv(x, p["w1"], p["b1"]), p["g1"], p["be1"])
    r = jnp.maximum(c, 0.0)
    c = bn(conv(r, p["w2"], p["b2"]), p["g2"], p["be2"])
    i = bn(conv(x, p["wid"], p["bid"]), p["g3"], p["be3"])
    return jnp.maximum(c + i, 0.0)


if __name__ == "__main__":
    key = jax.random.PRNGKey(0)
    kx, kp = jax.random.split(key)
    B, Cin, H, W, Cout = 2, 4, 16, 16, 8
    x = jax.random.normal(kx, (B, Cin, H, W), jnp.float32)
    params = init_params(kp, Cin, Cout)

    fwd = jax.jit(conv_block, static_argnames=("compute_dtype",))
    ref = jax.block_until_ready(ref_conv_block(x, params))

    # f32 path (f32 matmuls + f32 intermediates): tight check vs lax.conv ref.
    out_f32 = jax.block_until_ready(fwd(x, params, compute_dtype=jnp.float32))
    assert out_f32.shape == (B, Cout, H, W), out_f32.shape
    err32 = float(jnp.max(jnp.abs(out_f32.astype(jnp.float32) - ref)))
    assert err32 < 1e-3, f"f32 path mismatch: {err32}"

    # bf16 path (default perf configuration: bf16 matmuls + bf16 intermediates).
    out_bf16 = jax.block_until_ready(fwd(x, params, compute_dtype=jnp.bfloat16))
    err16 = float(jnp.max(jnp.abs(out_bf16.astype(jnp.float32) - ref)))
    assert err16 < 2e-1, f"bf16 path mismatch: {err16}"

    print("KERNEL_OK")
</pallas_src>

<mosaic_0001>
module attributes {stable_mosaic.version = 11 : i64} {
  func.func @_kernel_a(%arg0: i32, %arg1: memref<1x4x256xf32, #tpu.memory_space<vmem>>, %arg2: memref<3x8x12xf32, #tpu.memory_space<vmem>>, %arg3: memref<8x4xf32, #tpu.memory_space<vmem>>, %arg4: memref<8x2xf32, #tpu.memory_space<vmem>>, %arg5: memref<2x256xf32, #tpu.memory_space<vmem>>, %arg6: memref<1x8x256xf32, #tpu.memory_space<vmem>>, %arg7: memref<1x8x4xf32, #tpu.memory_space<vmem>>, %arg8: memref<12x256xf32, #tpu.memory_space<vmem>>) attributes {dimension_semantics = [#tpu.dimension_semantics<parallel>], iteration_bounds = array<i64: 2>, scalar_prefetch = 0 : i64, scratch_operands = 1 : i64, tpu.core_type = #tpu.core_type<tc>, window_params = [{transform_indices = @transform_0, window_bounds = array<i64: 1, 4, 256>}, {pipeline_mode = #tpu.pipeline_mode<synchronous>, transform_indices = @transform_1, window_bounds = array<i64: 3, 8, 12>}, {pipeline_mode = #tpu.pipeline_mode<synchronous>, transform_indices = @transform_2, window_bounds = array<i64: 8, 4>}, {pipeline_mode = #tpu.pipeline_mode<synchronous>, transform_indices = @transform_3, window_bounds = array<i64: 8, 2>}, {pipeline_mode = #tpu.pipeline_mode<synchronous>, transform_indices = @transform_4, window_bounds = array<i64: 2, 256>}, {transform_indices = @transform_5, window_bounds = array<i64: 1, 8, 256>}, {transform_indices = @transform_6, window_bounds = array<i64: 1, 8, 4>}]} {
    %c0 = arith.constant 0 : index
    %c0_0 = arith.constant 0 : index
    %c0_1 = arith.constant 0 : index
    %0 = vector.load %arg1[%c0, %c0_0, %c0_1] : memref<1x4x256xf32, #tpu.memory_space<vmem>>, vector<1x4x256xf32>
    %1 = vector.shape_cast %0 : vector<1x4x256xf32> to vector<4x256xf32>
    %c0_2 = arith.constant 0 : index
    %c0_3 = arith.constant 0 : index
    %2 = vector.load %arg5[%c0_2, %c0_3] : memref<2x256xf32, #tpu.memory_space<vmem>>, vector<2x256xf32>
    %cst = arith.constant 0.000000e+00 : f32
    %3 = vector.broadcast %cst : f32 to vector<4x16xf32>
    %c0_4 = arith.constant 0 : index
    %c0_5 = arith.constant 0 : index
    %4 = vector.load %arg8[%c0_4, %c0_5] : memref<12x256xf32, #tpu.memory_space<vmem>>, vector<4x16xf32>
    tpu.vector_store %arg8[%c0_4, %c0_5], %3 {strides = array<i32>} : memref<12x256xf32, #tpu.memory_space<vmem>>, vector<4x16xf32>,
    %5 = vector.extract_strided_slice %1 {offsets = [0, 0], sizes = [4, 240], strides = [1, 1]} : vector<4x256xf32> to vector<4x240xf32>
    %c0_6 = arith.constant 0 : index
    %c16 = arith.constant 16 : index
    %6 = vector.load %arg8[%c0_6, %c16] : memref<12x256xf32, #tpu.memory_space<vmem>>, vector<4x240xf32>
    tpu.vector_store %arg8[%c0_6, %c16], %5 {strides = array<i32>} : memref<12x256xf32, #tpu.memory_space<vmem>>, vector<4x240xf32>,
    %c4 = arith.constant 4 : index
    %c0_7 = arith.constant 0 : index
    %7 = vector.load %arg8[%c4, %c0_7] : memref<12x256xf32, #tpu.memory_space<vmem>>, vector<4x256xf32>
    tpu.vector_store %arg8[%c4, %c0_7], %1 {strides = array<i32>} : memref<12x256xf32, #tpu.memory_space<vmem>>, vector<4x256xf32>,
    %8 = vector.extract_strided_slice %1 {offsets = [0, 16], sizes = [4, 240], strides = [1, 1]} : vector<4x256xf32> to vector<4x240xf32>
    %c8 = arith.constant 8 : index
    %c0_8 = arith.constant 0 : index
    %9 = vector.load %arg8[%c8, %c0_8] : memref<12x256xf32, #tpu.memory_space<vmem>>, vector<4x240xf32>
    tpu.vector_store %arg8[%c8, %c0_8], %8 {strides = array<i32>} : memref<12x256xf32, #tpu.memory_space<vmem>>, vector<4x240xf32>,
    %c8_9 = arith.constant 8 : index
    %c240 = arith.constant 240 : index
    %10 = vector.load %arg8[%c8_9, %c240] : memref<12x256xf32, #tpu.memory_space<vmem>>, vector<4x16xf32>
    tpu.vector_store %arg8[%c8_9, %c240], %3 {strides = array<i32>} : memref<12x256xf32, #tpu.memory_space<vmem>>, vector<4x16xf32>,
    %c0_10 = arith.constant 0 : index
    %c0_11 = arith.constant 0 : index
    %11 = vector.load %arg8[%c0_10, %c0_11] : memref<12x256xf32, #tpu.memory_space<vmem>>, vector<12x256xf32>
    %c0_12 = arith.constant 0 : index
    %c0_13 = arith.constant 0 : index
    %c0_14 = arith.constant 0 : index
    %12 = vector.load %arg2[%c0_12, %c0_13, %c0_14] : memref<3x8x12xf32, #tpu.memory_space<vmem>>, vector<1x8x12xf32>
    %13 = vector.shape_cast %12 : vector<1x8x12xf32> to vector<8x12xf32>
    %cst_15 = arith.constant dense<0.000000e+00> : vector<8x256xf32>
    %14 = tpu.matmul %13, %11, %cst_15 {dimension_numbers = #tpu.dot_dimension_numbers<[1], [0], [0], [1], [0, 0, 1, 1], [], []>} : vector<8x12xf32>, vector<12x256xf32>, vector<8x256xf32> -> vector<8x256xf32>
    %c1 = arith.constant 1 : index
    %c0_16 = arith.constant 0 : index
    %c0_17 = arith.constant 0 : index
    %15 = vector.load %arg2[%c1, %c0_16, %c0_17] : memref<3x8x12xf32, #tpu.memory_space<vmem>>, vector<1x8x12xf32>
    %16 = vector.shape_cast %15 : vector<1x8x12xf32> to vector<8x12xf32>
    %cst_18 = arith.constant dense<0.000000e+00> : vector<8x256xf32>
    %17 = tpu.matmul %16, %11, %cst_18 {dimension_numbers = #tpu.dot_dimension_numbers<[1], [0], [0], [1], [0, 0, 1, 1], [], []>} : vector<8x12xf32>, vector<12x256xf32>, vector<8x256xf32> -> vector<8x256xf32>
    %c2 = arith.constant 2 : index
    %c0_19 = arith.constant 0 : index
    %c0_20 = arith.constant 0 : index
    %18 = vector.load %arg2[%c2, %c0_19, %c0_20] : memref<3x8x12xf32, #tpu.memory_space<vmem>>, vector<1x8x12xf32>
    %19 = vector.shape_cast %18 : vector<1x8x12xf32> to vector<8x12xf32>
    %cst_21 = arith.constant dense<0.000000e+00> : vector<8x256xf32>
    %20 = tpu.matmul %19, %11, %cst_21 {dimension_numbers = #tpu.dot_dimension_numbers<[1], [0], [0], [1], [0, 0, 1, 1], [], []>} : vector<8x12xf32>, vector<12x256xf32>, vector<8x256xf32> -> vector<8x256xf32>
    %cst_22 = arith.constant 0.000000e+00 : f32
    %21 = vector.broadcast %cst_22 : f32 to vector<8x1xf32>
    %22 = vector.extract_strided_slice %14 {offsets = [0, 0], sizes = [8, 255], strides = [1, 1]} : vector<8x256xf32> to vector<8x255xf32>
    %23 = tpu.concatenate %21, %22 in 1 : vector<8x1xf32>, vector<8x255xf32> -> vector<8x256xf32>
    %24 = vector.extract_strided_slice %2 {offsets = [0, 0], sizes = [1, 256], strides = [1, 1]} : vector<2x256xf32> to vector<1x256xf32>
    %25 = vector.broadcast %24 : vector<1x256xf32> to vector<8x256xf32>
    %26 = arith.mulf %23, %25 : vector<8x256xf32>
    %27 = vector.extract_strided_slice %20 {offsets = [0, 1], sizes = [8, 255], strides = [1, 1]} : vector<8x256xf32> to vector<8x255xf32>
    %28 = tpu.concatenate %27, %21 in 1 : vector<8x255xf32>, vector<8x1xf32> -> vector<8x256xf32>
    %29 = vector.extract_strided_slice %2 {offsets = [1, 0], sizes = [1, 256], strides = [1, 1]} : vector<2x256xf32> to vector<1x256xf32>
    %30 = vector.broadcast %29 : vector<1x256xf32> to vector<8x256xf32>
    %31 = arith.mulf %28, %30 : vector<8x256xf32>
    %32 = arith.addf %17, %26 : vector<8x256xf32>
    %33 = arith.addf %32, %31 : vector<8x256xf32>
    %c0_23 = arith.constant 0 : index
    %c0_24 = arith.constant 0 : index
    %34 = vector.load %arg4[%c0_23, %c0_24] : memref<8x2xf32, #tpu.memory_space<vmem>>, vector<8x1xf32>
    %35 = vector.broadcast %34 : vector<8x1xf32> to vector<8x256xf32>
    %36 = arith.addf %33, %35 : vector<8x256xf32>
    %c0_25 = arith.constant 0 : index
    %c0_26 = arith.constant 0 : index
    %37 = vector.load %arg3[%c0_25, %c0_26] : memref<8x4xf32, #tpu.memory_space<vmem>>, vector<8x4xf32>
    %cst_27 = arith.constant dense<0.000000e+00> : vector<8x256xf32>
    %38 = tpu.matmul %37, %1, %cst_27 {dimension_numbers = #tpu.dot_dimension_numbers<[1], [0], [0], [1], [0, 0, 1, 1], [], []>} : vector<8x4xf32>, vector<4x256xf32>, vector<8x256xf32> -> vector<8x256xf32>
    %c0_28 = arith.constant 0 : index
    %c1_29 = arith.constant 1 : index
    %39 = vector.load %arg4[%c0_28, %c1_29] : memref<8x2xf32, #tpu.memory_space<vmem>>, vector<8x1xf32>
    %40 = vector.broadcast %39 : vector<8x1xf32> to vector<8x256xf32>
    %41 = arith.addf %38, %40 : vector<8x256xf32>
    %cst_30 = arith.constant dense<0.000000e+00> : vector<8xf32>
    %42 = vector.multi_reduction <add>, %36, %cst_30 [1] : vector<8x256xf32> to vector<8xf32>
    %43 = vector.shape_cast %42 : vector<8xf32> to vector<8x1xf32>
    %44 = arith.mulf %36, %36 : vector<8x256xf32>
    %cst_31 = arith.constant dense<0.000000e+00> : vector<8xf32>
    %45 = vector.multi_reduction <add>, %44, %cst_31 [1] : vector<8x256xf32> to vector<8xf32>
    %46 = vector.shape_cast %45 : vector<8xf32> to vector<8x1xf32>
    %cst_32 = arith.constant dense<0.000000e+00> : vector<8xf32>
    %47 = vector.multi_reduction <add>, %41, %cst_32 [1] : vector<8x256xf32> to vector<8xf32>
    %48 = vector.shape_cast %47 : vector<8xf32> to vector<8x1xf32>
    %49 = arith.mulf %41, %41 : vector<8x256xf32>
    %cst_33 = arith.constant dense<0.000000e+00> : vector<8xf32>
    %50 = vector.multi_reduction <add>, %49, %cst_33 [1] : vector<8x256xf32> to vector<8xf32>
    %51 = vector.shape_cast %50 : vector<8xf32> to vector<8x1xf32>
    %52 = tpu.concatenate %43, %46, %48, %51 in 1 : vector<8x1xf32>, vector<8x1xf32>, vector<8x1xf32>, vector<8x1xf32> -> vector<8x4xf32>
    %c0_34 = arith.constant 0 : index
    %c0_35 = arith.constant 0 : index
    %c0_36 = arith.constant 0 : index
    %53 = vector.load %arg7[%c0_34, %c0_35, %c0_36] : memref<1x8x4xf32, #tpu.memory_space<vmem>>, vector<1x8x4xf32>
    %54 = vector.shape_cast %53 : vector<1x8x4xf32> to vector<8x4xf32>
    %55 = vector.shape_cast %52 : vector<8x4xf32> to vector<1x8x4xf32>
    tpu.vector_store %arg7[%c0_34, %c0_35, %c0_36], %55 {strides = array<i32>} : memref<1x8x4xf32, #tpu.memory_space<vmem>>, vector<1x8x4xf32>,
    %c0_37 = arith.constant 0 : index
    %c0_38 = arith.constant 0 : index
    %c0_39 = arith.constant 0 : index
    %56 = vector.load %arg6[%c0_37, %c0_38, %c0_39] : memref<1x8x256xf32, #tpu.memory_space<vmem>>, vector<1x8x256xf32>
    %57 = vector.shape_cast %56 : vector<1x8x256xf32> to vector<8x256xf32>
    %58 = vector.shape_cast %36 : vector<8x256xf32> to vector<1x8x256xf32>
    tpu.vector_store %arg6[%c0_37, %c0_38, %c0_39], %58 {strides = array<i32>} : memref<1x8x256xf32, #tpu.memory_space<vmem>>, vector<1x8x256xf32>,
    return
  }
  func.func @transform_0(%arg0: i32) -> (i32, i32, i32) {
    %c0_i32 = arith.constant 0 : i32
    %c0_i32_0 = arith.constant 0 : i32
    %c0_i32_1 = arith.constant 0 : i32
    return %arg0, %c0_i32, %c0_i32_0 : i32, i32, i32
  }
  func.func @transform_1(%arg0: i32) -> (i32, i32, i32) {
    %c0_i32 = arith.constant 0 : i32
    %c0_i32_0 = arith.constant 0 : i32
    %c0_i32_1 = arith.constant 0 : i32
    %c0_i32_2 = arith.constant 0 : i32
    return %c0_i32, %c0_i32_0, %c0_i32_1 : i32, i32, i32
  }
  func.func @transform_2(%arg0: i32) -> (i32, i32) {
    %c0_i32 = arith.constant 0 : i32
    %c0_i32_0 = arith.constant 0 : i32
    %c0_i32_1 = arith.constant 0 : i32
    return %c0_i32, %c0_i32_0 : i32, i32
  }
  func.func @transform_3(%arg0: i32) -> (i32, i32) {
    %c0_i32 = arith.constant 0 : i32
    %c0_i32_0 = arith.constant 0 : i32
    %c0_i32_1 = arith.constant 0 : i32
    return %c0_i32, %c0_i32_0 : i32, i32
  }
  func.func @transform_4(%arg0: i32) -> (i32, i32) {
    %c0_i32 = arith.constant 0 : i32
    %c0_i32_0 = arith.constant 0 : i32
    %c0_i32_1 = arith.constant 0 : i32
    return %c0_i32, %c0_i32_0 : i32, i32
  }
  func.func @transform_5(%arg0: i32) -> (i32, i32, i32) {
    %c0_i32 = arith.constant 0 : i32
    %c0_i32_0 = arith.constant 0 : i32
    %c0_i32_1 = arith.constant 0 : i32
    return %arg0, %c0_i32, %c0_i32_0 : i32, i32, i32
  }
  func.func @transform_6(%arg0: i32) -> (i32, i32, i32) {
    %c0_i32 = arith.constant 0 : i32
    %c0_i32_0 = arith.constant 0 : i32
    %c0_i32_1 = arith.constant 0 : i32
    return %arg0, %c0_i32, %c0_i32_0 : i32, i32, i32
  }
}

module attributes {stable_mosaic.version = 11 : i64} {
  func.func @_kernel_b(%arg0: i32, %arg1: memref<1x8x256xf32, #tpu.memory_space<vmem>>, %arg2: memref<3x8x24xf32, #tpu.memory_space<vmem>>, %arg3: memref<8x3xf32, #tpu.memory_space<vmem>>, %arg4: memref<2x256xf32, #tpu.memory_space<vmem>>, %arg5: memref<1x8x256xf32, #tpu.memory_space<vmem>>, %arg6: memref<1x8x2xf32, #tpu.memory_space<vmem>>, %arg7: memref<24x256xf32, #tpu.memory_space<vmem>>) attributes {dimension_semantics = [#tpu.dimension_semantics<parallel>], iteration_bounds = array<i64: 2>, scalar_prefetch = 0 : i64, scratch_operands = 1 : i64, tpu.core_type = #tpu.core_type<tc>, window_params = [{transform_indices = @transform_0, window_bounds = array<i64: 1, 8, 256>}, {pipeline_mode = #tpu.pipeline_mode<synchronous>, transform_indices = @transform_1, window_bounds = array<i64: 3, 8, 24>}, {pipeline_mode = #tpu.pipeline_mode<synchronous>, transform_indices = @transform_2, window_bounds = array<i64: 8, 3>}, {pipeline_mode = #tpu.pipeline_mode<synchronous>, transform_indices = @transform_3, window_bounds = array<i64: 2, 256>}, {transform_indices = @transform_4, window_bounds = array<i64: 1, 8, 256>}, {transform_indices = @transform_5, window_bounds = array<i64: 1, 8, 2>}]} {
    %c0 = arith.constant 0 : index
    %c0_0 = arith.constant 0 : index
    %0 = vector.load %arg4[%c0, %c0_0] : memref<2x256xf32, #tpu.memory_space<vmem>>, vector<2x256xf32>
    %c0_1 = arith.constant 0 : index
    %c0_2 = arith.constant 0 : index
    %1 = vector.load %arg3[%c0_1, %c0_2] : memref<8x3xf32, #tpu.memory_space<vmem>>, vector<8x1xf32>
    %c0_3 = arith.constant 0 : index
    %c1 = arith.constant 1 : index
    %2 = vector.load %arg3[%c0_3, %c1] : memref<8x3xf32, #tpu.memory_space<vmem>>, vector<8x1xf32>
    %c0_4 = arith.constant 0 : index
    %c2 = arith.constant 2 : index
    %3 = vector.load %arg3[%c0_4, %c2] : memref<8x3xf32, #tpu.memory_space<vmem>>, vector<8x1xf32>
    %c0_5 = arith.constant 0 : index
    %c0_6 = arith.constant 0 : index
    %c0_7 = arith.constant 0 : index
    %4 = vector.load %arg1[%c0_5, %c0_6, %c0_7] : memref<1x8x256xf32, #tpu.memory_space<vmem>>, vector<1x8x256xf32>
    %5 = vector.shape_cast %4 : vector<1x8x256xf32> to vector<8x256xf32>
    %6 = vector.broadcast %1 : vector<8x1xf32> to vector<8x256xf32>
    %7 = arith.mulf %5, %6 : vector<8x256xf32>
    %8 = vector.broadcast %2 : vector<8x1xf32> to vector<8x256xf32>
    %9 = arith.addf %7, %8 : vector<8x256xf32>
    %cst = arith.constant 0.000000e+00 : f32
    %10 = vector.broadcast %cst : f32 to vector<8x256xf32>
    %11 = arith.maximumf %9, %10 : vector<8x256xf32>
    %cst_8 = arith.constant 0.000000e+00 : f32
    %12 = vector.broadcast %cst_8 : f32 to vector<8x16xf32>
    %c0_9 = arith.constant 0 : index
    %c0_10 = arith.constant 0 : index
    %13 = vector.load %arg7[%c0_9, %c0_10] : memref<24x256xf32, #tpu.memory_space<vmem>>, vector<8x16xf32>
    tpu.vector_store %arg7[%c0_9, %c0_10], %12 {strides = array<i32>} : memref<24x256xf32, #tpu.memory_space<vmem>>, vector<8x16xf32>,
    %14 = vector.extract_strided_slice %11 {offsets = [0, 0], sizes = [8, 240], strides = [1, 1]} : vector<8x256xf32> to vector<8x240xf32>
    %c0_11 = arith.constant 0 : index
    %c16 = arith.constant 16 : index
    %15 = vector.load %arg7[%c0_11, %c16] : memref<24x256xf32, #tpu.memory_space<vmem>>, vector<8x240xf32>
    tpu.vector_store %arg7[%c0_11, %c16], %14 {strides = array<i32>} : memref<24x256xf32, #tpu.memory_space<vmem>>, vector<8x240xf32>,
    %c8 = arith.constant 8 : index
    %c0_12 = arith.constant 0 : index
    %16 = vector.load %arg7[%c8, %c0_12] : memref<24x256xf32, #tpu.memory_space<vmem>>, vector<8x256xf32>
    tpu.vector_store %arg7[%c8, %c0_12], %11 {strides = array<i32>} : memref<24x256xf32, #tpu.memory_space<vmem>>, vector<8x256xf32>,
    %17 = vector.extract_strided_slice %11 {offsets = [0, 16], sizes = [8, 240], strides = [1, 1]} : vector<8x256xf32> to vector<8x240xf32>
    %c16_13 = arith.constant 16 : index
    %c0_14 = arith.constant 0 : index
    %18 = vector.load %arg7[%c16_13, %c0_14] : memref<24x256xf32, #tpu.memory_space<vmem>>, vector<8x240xf32>
    tpu.vector_store %arg7[%c16_13, %c0_14], %17 {strides = array<i32>} : memref<24x256xf32, #tpu.memory_space<vmem>>, vector<8x240xf32>,
    %c16_15 = arith.constant 16 : index
    %c240 = arith.constant 240 : index
    %19 = vector.load %arg7[%c16_15, %c240] : memref<24x256xf32, #tpu.memory_space<vmem>>, vector<8x16xf32>
    tpu.vector_store %arg7[%c16_15, %c240], %12 {strides = array<i32>} : memref<24x256xf32, #tpu.memory_space<vmem>>, vector<8x16xf32>,
    %c0_16 = arith.constant 0 : index
    %c0_17 = arith.constant 0 : index
    %20 = vector.load %arg7[%c0_16, %c0_17] : memref<24x256xf32, #tpu.memory_space<vmem>>, vector<24x256xf32>
    %c0_18 = arith.constant 0 : index
    %c0_19 = arith.constant 0 : index
    %c0_20 = arith.constant 0 : index
    %21 = vector.load %arg2[%c0_18, %c0_19, %c0_20] : memref<3x8x24xf32, #tpu.memory_space<vmem>>, vector<1x8x24xf32>
    %22 = vector.shape_cast %21 : vector<1x8x24xf32> to vector<8x24xf32>
    %cst_21 = arith.constant dense<0.000000e+00> : vector<8x256xf32>
    %23 = tpu.matmul %22, %20, %cst_21 {dimension_numbers = #tpu.dot_dimension_numbers<[1], [0], [0], [1], [0, 0, 1, 1], [], []>} : vector<8x24xf32>, vector<24x256xf32>, vector<8x256xf32> -> vector<8x256xf32>
    %c1_22 = arith.constant 1 : index
    %c0_23 = arith.constant 0 : index
    %c0_24 = arith.constant 0 : index
    %24 = vector.load %arg2[%c1_22, %c0_23, %c0_24] : memref<3x8x24xf32, #tpu.memory_space<vmem>>, vector<1x8x24xf32>
    %25 = vector.shape_cast %24 : vector<1x8x24xf32> to vector<8x24xf32>
    %cst_25 = arith.constant dense<0.000000e+00> : vector<8x256xf32>
    %26 = tpu.matmul %25, %20, %cst_25 {dimension_numbers = #tpu.dot_dimension_numbers<[1], [0], [0], [1], [0, 0, 1, 1], [], []>} : vector<8x24xf32>, vector<24x256xf32>, vector<8x256xf32> -> vector<8x256xf32>
    %c2_26 = arith.constant 2 : index
    %c0_27 = arith.constant 0 : index
    %c0_28 = arith.constant 0 : index
    %27 = vector.load %arg2[%c2_26, %c0_27, %c0_28] : memref<3x8x24xf32, #tpu.memory_space<vmem>>, vector<1x8x24xf32>
    %28 = vector.shape_cast %27 : vector<1x8x24xf32> to vector<8x24xf32>
    %cst_29 = arith.constant dense<0.000000e+00> : vector<8x256xf32>
    %29 = tpu.matmul %28, %20, %cst_29 {dimension_numbers = #tpu.dot_dimension_numbers<[1], [0], [0], [1], [0, 0, 1, 1], [], []>} : vector<8x24xf32>, vector<24x256xf32>, vector<8x256xf32> -> vector<8x256xf32>
    %cst_30 = arith.constant 0.000000e+00 : f32
    %30 = vector.broadcast %cst_30 : f32 to vector<8x1xf32>
    %31 = vector.extract_strided_slice %23 {offsets = [0, 0], sizes = [8, 255], strides = [1, 1]} : vector<8x256xf32> to vector<8x255xf32>
    %32 = tpu.concatenate %30, %31 in 1 : vector<8x1xf32>, vector<8x255xf32> -> vector<8x256xf32>
    %33 = vector.extract_strided_slice %0 {offsets = [0, 0], sizes = [1, 256], strides = [1, 1]} : vector<2x256xf32> to vector<1x256xf32>
    %34 = vector.broadcast %33 : vector<1x256xf32> to vector<8x256xf32>
    %35 = arith.mulf %32, %34 : vector<8x256xf32>
    %36 = vector.extract_strided_slice %29 {offsets = [0, 1], sizes = [8, 255], strides = [1, 1]} : vector<8x256xf32> to vector<8x255xf32>
    %37 = tpu.concatenate %36, %30 in 1 : vector<8x255xf32>, vector<8x1xf32> -> vector<8x256xf32>
    %38 = vector.extract_strided_slice %0 {offsets = [1, 0], sizes = [1, 256], strides = [1, 1]} : vector<2x256xf32> to vector<1x256xf32>
    %39 = vector.broadcast %38 : vector<1x256xf32> to vector<8x256xf32>
    %40 = arith.mulf %37, %39 : vector<8x256xf32>
    %41 = arith.addf %26, %35 : vector<8x256xf32>
    %42 = arith.addf %41, %40 : vector<8x256xf32>
    %43 = vector.broadcast %3 : vector<8x1xf32> to vector<8x256xf32>
    %44 = arith.addf %42, %43 : vector<8x256xf32>
    %cst_31 = arith.constant dense<0.000000e+00> : vector<8xf32>
    %45 = vector.multi_reduction <add>, %44, %cst_31 [1] : vector<8x256xf32> to vector<8xf32>
    %46 = vector.shape_cast %45 : vector<8xf32> to vector<8x1xf32>
    %47 = arith.mulf %44, %44 : vector<8x256xf32>
    %cst_32 = arith.constant dense<0.000000e+00> : vector<8xf32>
    %48 = vector.multi_reduction <add>, %47, %cst_32 [1] : vector<8x256xf32> to vector<8xf32>
    %49 = vector.shape_cast %48 : vector<8xf32> to vector<8x1xf32>
    %50 = tpu.concatenate %46, %49 in 1 : vector<8x1xf32>, vector<8x1xf32> -> vector<8x2xf32>
    %c0_33 = arith.constant 0 : index
    %c0_34 = arith.constant 0 : index
    %c0_35 = arith.constant 0 : index
    %51 = vector.load %arg6[%c0_33, %c0_34, %c0_35] : memref<1x8x2xf32, #tpu.memory_space<vmem>>, vector<1x8x2xf32>
    %52 = vector.shape_cast %51 : vector<1x8x2xf32> to vector<8x2xf32>
    %53 = vector.shape_cast %50 : vector<8x2xf32> to vector<1x8x2xf32>
    tpu.vector_store %arg6[%c0_33, %c0_34, %c0_35], %53 {strides = array<i32>} : memref<1x8x2xf32, #tpu.memory_space<vmem>>, vector<1x8x2xf32>,
    %c0_36 = arith.constant 0 : index
    %c0_37 = arith.constant 0 : index
    %c0_38 = arith.constant 0 : index
    %54 = vector.load %arg5[%c0_36, %c0_37, %c0_38] : memref<1x8x256xf32, #tpu.memory_space<vmem>>, vector<1x8x256xf32>
    %55 = vector.shape_cast %54 : vector<1x8x256xf32> to vector<8x256xf32>
    %56 = vector.shape_cast %44 : vector<8x256xf32> to vector<1x8x256xf32>
    tpu.vector_store %arg5[%c0_36, %c0_37, %c0_38], %56 {strides = array<i32>} : memref<1x8x256xf32, #tpu.memory_space<vmem>>, vector<1x8x256xf32>,
    return
  }
  func.func @transform_0(%arg0: i32) -> (i32, i32, i32) {
    %c0_i32 = arith.constant 0 : i32
    %c0_i32_0 = arith.constant 0 : i32
    %c0_i32_1 = arith.constant 0 : i32
    return %arg0, %c0_i32, %c0_i32_0 : i32, i32, i32
  }
  func.func @transform_1(%arg0: i32) -> (i32, i32, i32) {
    %c0_i32 = arith.constant 0 : i32
    %c0_i32_0 = arith.constant 0 : i32
    %c0_i32_1 = arith.constant 0 : i32
    %c0_i32_2 = arith.constant 0 : i32
    return %c0_i32, %c0_i32_0, %c0_i32_1 : i32, i32, i32
  }
  func.func @transform_2(%arg0: i32) -> (i32, i32) {
    %c0_i32 = arith.constant 0 : i32
    %c0_i32_0 = arith.constant 0 : i32
    %c0_i32_1 = arith.constant 0 : i32
    return %c0_i32, %c0_i32_0 : i32, i32
  }
  func.func @transform_3(%arg0: i32) -> (i32, i32) {
    %c0_i32 = arith.constant 0 : i32
    %c0_i32_0 = arith.constant 0 : i32
    %c0_i32_1 = arith.constant 0 : i32
    return %c0_i32, %c0_i32_0 : i32, i32
  }
  func.func @transform_4(%arg0: i32) -> (i32, i32, i32) {
    %c0_i32 = arith.constant 0 : i32
    %c0_i32_0 = arith.constant 0 : i32
    %c0_i32_1 = arith.constant 0 : i32
    return %arg0, %c0_i32, %c0_i32_0 : i32, i32, i32
  }
  func.func @transform_5(%arg0: i32) -> (i32, i32, i32) {
    %c0_i32 = arith.constant 0 : i32
    %c0_i32_0 = arith.constant 0 : i32
    %c0_i32_1 = arith.constant 0 : i32
    return %arg0, %c0_i32, %c0_i32_0 : i32, i32, i32
  }
}

module attributes {stable_mosaic.version = 11 : i64} {
  func.func @_kernel_c(%arg0: i32, %arg1: memref<1x8x256xf32, #tpu.memory_space<vmem>>, %arg2: memref<1x4x256xf32, #tpu.memory_space<vmem>>, %arg3: memref<8x4xf32, #tpu.memory_space<vmem>>, %arg4: memref<8x2xf32, #tpu.memory_space<vmem>>, %arg5: memref<1x8x256xf32, #tpu.memory_space<vmem>>) attributes {dimension_semantics = [#tpu.dimension_semantics<parallel>], iteration_bounds = array<i64: 2>, scalar_prefetch = 0 : i64, scratch_operands = 0 : i64, tpu.core_type = #tpu.core_type<tc>, window_params = [{transform_indices = @transform_0, window_bounds = array<i64: 1, 8, 256>}, {transform_indices = @transform_1, window_bounds = array<i64: 1, 4, 256>}, {pipeline_mode = #tpu.pipeline_mode<synchronous>, transform_indices = @transform_2, window_bounds = array<i64: 8, 4>}, {pipeline_mode = #tpu.pipeline_mode<synchronous>, transform_indices = @transform_3, window_bounds = array<i64: 8, 2>}, {transform_indices = @transform_4, window_bounds = array<i64: 1, 8, 256>}]} {
    %c0 = arith.constant 0 : index
    %c0_0 = arith.constant 0 : index
    %0 = vector.load %arg4[%c0, %c0_0] : memref<8x2xf32, #tpu.memory_space<vmem>>, vector<8x1xf32>
    %c0_1 = arith.constant 0 : index
    %c1 = arith.constant 1 : index
    %1 = vector.load %arg4[%c0_1, %c1] : memref<8x2xf32, #tpu.memory_space<vmem>>, vector<8x1xf32>
    %c0_2 = arith.constant 0 : index
    %c0_3 = arith.constant 0 : index
    %2 = vector.load %arg3[%c0_2, %c0_3] : memref<8x4xf32, #tpu.memory_space<vmem>>, vector<8x4xf32>
    %c0_4 = arith.constant 0 : index
    %c0_5 = arith.constant 0 : index
    %c0_6 = arith.constant 0 : index
    %3 = vector.load %arg2[%c0_4, %c0_5, %c0_6] : memref<1x4x256xf32, #tpu.memory_space<vmem>>, vector<1x4x256xf32>
    %4 = vector.shape_cast %3 : vector<1x4x256xf32> to vector<4x256xf32>
    %cst = arith.constant dense<0.000000e+00> : vector<8x256xf32>
    %5 = tpu.matmul %2, %4, %cst {dimension_numbers = #tpu.dot_dimension_numbers<[1], [0], [0], [1], [0, 0, 1, 1], [], []>} : vector<8x4xf32>, vector<4x256xf32>, vector<8x256xf32> -> vector<8x256xf32>
    %c0_7 = arith.constant 0 : index
    %c0_8 = arith.constant 0 : index
    %c0_9 = arith.constant 0 : index
    %6 = vector.load %arg1[%c0_7, %c0_8, %c0_9] : memref<1x8x256xf32, #tpu.memory_space<vmem>>, vector<1x8x256xf32>
    %7 = vector.shape_cast %6 : vector<1x8x256xf32> to vector<8x256xf32>
    %8 = vector.broadcast %0 : vector<8x1xf32> to vector<8x256xf32>
    %9 = arith.mulf %7, %8 : vector<8x256xf32>
    %10 = arith.addf %9, %5 : vector<8x256xf32>
    %11 = vector.broadcast %1 : vector<8x1xf32> to vector<8x256xf32>
    %12 = arith.addf %10, %11 : vector<8x256xf32>
    %cst_10 = arith.constant 0.000000e+00 : f32
    %13 = vector.broadcast %cst_10 : f32 to vector<8x256xf32>
    %14 = arith.maximumf %12, %13 : vector<8x256xf32>
    %c0_11 = arith.constant 0 : index
    %c0_12 = arith.constant 0 : index
    %c0_13 = arith.constant 0 : index
    %15 = vector.load %arg5[%c0_11, %c0_12, %c0_13] : memref<1x8x256xf32, #tpu.memory_space<vmem>>, vector<1x8x256xf32>
    %16 = vector.shape_cast %15 : vector<1x8x256xf32> to vector<8x256xf32>
    %17 = vector.shape_cast %14 : vector<8x256xf32> to vector<1x8x256xf32>
    tpu.vector_store %arg5[%c0_11, %c0_12, %c0_13], %17 {strides = array<i32>} : memref<1x8x256xf32, #tpu.memory_space<vmem>>, vector<1x8x256xf32>,
    return
  }
  func.func @transform_0(%arg0: i32) -> (i32, i32, i32) {
    %c0_i32 = arith.constant 0 : i32
    %c0_i32_0 = arith.constant 0 : i32
    %c0_i32_1 = arith.constant 0 : i32
    return %arg0, %c0_i32, %c0_i32_0 : i32, i32, i32
  }
  func.func @transform_1(%arg0: i32) -> (i32, i32, i32) {
    %c0_i32 = arith.constant 0 : i32
    %c0_i32_0 = arith.constant 0 : i32
    %c0_i32_1 = arith.constant 0 : i32
    return %arg0, %c0_i32, %c0_i32_0 : i32, i32, i32
  }
  func.func @transform_2(%arg0: i32) -> (i32, i32) {
    %c0_i32 = arith.constant 0 : i32
    %c0_i32_0 = arith.constant 0 : i32
    %c0_i32_1 = arith.constant 0 : i32
    return %c0_i32, %c0_i32_0 : i32, i32
  }
  func.func @transform_3(%arg0: i32) -> (i32, i32) {
    %c0_i32 = arith.constant 0 : i32
    %c0_i32_0 = arith.constant 0 : i32
    %c0_i32_1 = arith.constant 0 : i32
    return %c0_i32, %c0_i32_0 : i32, i32
  }
  func.func @transform_4(%arg0: i32) -> (i32, i32, i32) {
    %c0_i32 = arith.constant 0 : i32
    %c0_i32_0 = arith.constant 0 : i32
    %c0_i32_1 = arith.constant 0 : i32
    return %arg0, %c0_i32, %c0_i32_0 : i32, i32, i32
  }
}

</mosaic_0001>

<bundles_post_ra>
// kernel: conv_block.3
= control target key start
LH: loop header
LB: loop body
LE: loop exit
PB: predicated region body
PF: predicated region fallthrough
CT: control target
= control target key end

     0   :  { %s920_s21 = smov 0   ;;  %s996_s0 = inlined_call_operand.vmem [shape: f32[2,4,256], index: 0, kind: input, shape index: {}]   ;;  %s997_s1 = inlined_call_operand.vmem [shape: f32[3,8,12], index: 1, kind: input, shape index: {}]   ;;  %s998_s2 = inlined_call_operand.vmem [shape: f32[8,4], index: 2, kind: input, shape index: {}]   ;;  %s999_s3 = inlined_call_operand.vmem [shape: f32[8,2], index: 3, kind: input, shape index: {}]   ;;  %s1000_s4 = inlined_call_operand.vmem [shape: f32[2,256], index: 4, kind: input, shape index: {}]   ;;  %s1001_s5 = inlined_call_operand.vmem [shape: f32[2,8,256], index: 5, kind: output, shape index: {0}]   ;;  %s1002_s6 = inlined_call_operand.vmem [shape: f32[2,8,4], index: 6, kind: output, shape index: {1}]  }
   0x1 LB: > { %s803_s22 = sadd.s32 4294967295, %s875_s21   ;;  %p807_p0 = scmp.ge.s32.totalorder %s875_s21, 1  ;;  %s875_s21 = sphi %s920_s21, %s17_s21  }
   0x2   : > { %p215_p1 = scmp.lt.s32.totalorder %s875_s21, 3 }
   0x4   : > { %p216_p2 = pnand %p807_p0, %p215_p1 }
   0x5   : > { %p249_p3 = scmp.lt.s32.totalorder (!%p216_p2), %s803_s22, 1  ;;  %vm265_vm0 = vcmask (!%p216_p2), 125952   ;;  %v877_v0 = vmov (!%p216_p2), 0.0   ;;  %s878_s27 = smov (!%p216_p2), 16   ;;  %v601_v4 = vld [vmem:[%s999_s3] sm:$0xff] (!%p216_p2)  ;;  %v880_v5 = vmov (!%p216_p2), 0   ;;  %v474_v32 = vlaneseq (!%p216_p2) }
   0x6   : > { %219 = sbr.rel (%p216_p2) target bundleno = 646 (0x286), region = 40  ;;  %266 = vst.msk [vmem:[#allocation2] sm:$0xf] (!%p216_p2), %vm265_vm0, %v877_v0  ;;  %377 = vmatprep.mubr.f32.mxu0 (!%p216_p2), %v877_v0  ;;  %455 = vmatprep.mubr.f32.mxu1 (!%p216_p2), %v877_v0  ;;  %s879_s28 = smov (!%p216_p2), 112   ;;  %vm277_vm1 = vcmask (!%p216_p2), 1043584   ;;  %vm293_vm2 = vcmask (!%p216_p2), 912384  }
   0x7   : > { %865 = vset.pattern.permute.xlu0 (!%p216_p2), %v880_v5  ;;  %vm295_vm3 = vcmask (!%p216_p2), 1044352   ;;  %vm273_vm4 = vcmask (!%p216_p2), 130048   ;;  %vm288_vm5 = vcmask (!%p216_p2), 916480   ;;  %vm306_vm6 = vcmask (!%p216_p2), 1043456   ;;  %v301_v19 = vld [vmem:[%s997_s1] sm:$0xff] (!%p216_p2)  ;;  %v817_v20 = vld [vmem:[%s997_s1 + $0x10] sm:$0xff] (!%p216_p2) }
   0x8   : > { %vm881_vm7 = vmmov (!%p216_p2), 1   ;;  %vm302_vm9 = vcmask (!%p216_p2), 97280   ;;  %v816_v21 = vld [vmem:[%s997_s1 + $0x8] sm:$0xff] (!%p216_p2)  ;;  %v609_v22 = vld [vmem:[%s998_s2] sm:$0xff] (!%p216_p2)  ;;  %vm614_vm10 = vcmask (!%p216_p2), 31744   ;;  %v882_v23 = vmov (!%p216_p2), 1  }
   0x9   : > { %vm944_vm8 = vmpackc.low (!%p216_p2), %vm306_vm6, %vm881_vm7  ;;  %s883_s15 = smov (!%p216_p2), 127   ;;  %s884_s16 = smov (!%p216_p2), 1   ;;  %v475_v33 = vshrl.u32 (!%p216_p2), %v474_v32, 7  ;;  %v264_v37 = vld [vmem:[%s1000_s4] sm:$0xf] (!%p216_p2)  ;;  %vm468_vm11 = vcmask (!%p216_p2), 7168  }
   0xa   : > { %vm500_vm12 = vcmask (!%p216_p2), 1039360   ;;  %vm710_vm13 = vcmask (!%p216_p2), 15360   ;;  %vm712_vm14 = vcmask (!%p216_p2), 23552  }
   0xb   : > { %v476_v35 = vsub.s32 (!%p216_p2), 0, %v475_v33  ;;  %v480_v36 = vsub.s32 (!%p216_p2), 2, %v475_v33  ;;  %v507_v40 = vsub.s32 (!%p216_p2), 1, %v475_v33  ;;  %v511_v41 = vsub.s32 (!%p216_p2), 3, %v475_v33 }
   0xd   : > { %s1006_s22 = smov (!%p249_p3, %s803_s22), 1  ;;  %v477_v38 = vrot.slane %v264_v37, %v476_v35  ;;  %v481_v39 = vrot.slane %v264_v37, %v480_v36  ;;  %v508_v46 = vrot.slane %v264_v37, %v507_v40  ;;  %v512_v47 = vrot.slane %v264_v37, %v511_v41 }
   0xe   : > { %s829_s23 = sshll.u32 %s1006_s22, 3  ;;  %s830_s19 = sshll.u32 %s1006_s22, 4 }
   0xf   : > { %s253_s26 = scalar_lea.vmem %s996_s0, %s829_s23  ;;  %v487_v44 = vrot.slane %v477_v38, %v476_v35  ;;  %v491_v45 = vrot.slane %v481_v39, %v476_v35  ;;  %v518_v53 = vrot.slane %v508_v46, %v507_v40  ;;  %v522_v54 = vrot.slane %v512_v47, %v507_v40  ;;  %s258_s25 = scalar_lea.vmem %s1001_s5, %s830_s19 }
  0x10   : > { %v263_v1 = vld [vmem:[%s253_s26] sm:$0xff] }
  0x11   : > { %269 = vrot.lane.b32.xlu0 %v263_v1, %s878_s27  ;;  %v280_v2 = vcombine.low %v263_v1, %v263_v1  ;;  %283 = vst [vmem:[#allocation2 + $0x8] sm:$0xf0] %v263_v1  ;;  %v268_v3 = vcombine.high %v263_v1, %v263_v1 }
  0x13   : > { %282 = vst [vmem:[#allocation2] sm:$0xf0] %v280_v2  ;;  %286 = vrot.lane.b32.xlu1 %v268_v3, %s879_s28 }
  0x15   : > { %271 = vrot.lane.b32.xlu0 %v268_v3, %s878_s27 }
  0x17   : > { %284 = vrot.lane.b32.xlu1 %v263_v1, %s879_s28  ;;  %s262_s28 = scalar_lea.vmem %s1002_s6, %s829_s23 }
  0x19   : > { %604 = vperm.xlu0 %865, %v601_v4  }
  0x1d   : > { %866 = vset.pattern.permute.xlu0 %v882_v23 }
  0x83   : > { %v270_v6 = vpop.permute.xlu0 %269 }
  0x84   : > { %278 = vst.msk [vmem:[#allocation2] sm:$0xf] %vm277_vm1, %v270_v6 }
  0x85   : > { %v287_v7 = vpop.permute.xlu1 %286 }
  0x86   : > { %294 = vst.msk [vmem:[#allocation2 + $0x18] sm:$0xf] %vm293_vm2, %v287_v7 }
  0x87   : > { %296 = vst.msk [vmem:[#allocation2 + $0x18] sm:$0xf] %vm295_vm3, %v877_v0  ;;  %v272_v8 = vpop.permute.xlu0 %271 }
  0x88   : > { %v274_v9 = vsel %vm273_vm4, %v270_v6, %v272_v8 }
  0x89   : > { %279 = vst [vmem:[#allocation2 + $0x8] sm:$0xf] %v274_v9  ;;  %v285_v10 = vpop.permute.xlu1 %284 }
  0x8a   : > { %v289_v11 = vsel %vm288_vm5, %v285_v10, %v287_v7 }
  0x8b   : > { %292 = vst [vmem:[#allocation2 + $0x10] sm:$0xf] %v289_v11  ;;  %v297_v16 = vld [vmem:[#allocation2] sm:$0xff] }
  0x8e   : > { %v300_v12 = vld [vmem:[#allocation2 + $0x18] sm:$0xf] }
  0x90   : > { %v298_v13 = vld [vmem:[#allocation2 + $0x8] sm:$0xff] }
  0x91   : > { %v831_v15 = vpack.c.bf16 %v300_v12, %v298_v13 }
  0x92   : > { %v299_v17 = vld [vmem:[#allocation2 + $0x10] sm:$0xf] }
  0x93   : > { %833 = vmatprep.subr.msk.bf16.mxu0 %vm944_vm8, %v831_v15  ;;  %839 = vmatprep.subr.msk.bf16.mxu1 %vm944_vm8, %v831_v15  ;;  %v834_v18 = vpack.c.bf16 %v299_v17, %v297_v16 }
  0x95   : > { %836 = vmatpush1.bf16.msk.msra.mxu0 %vm944_vm8, %v834_v18  ;;  %842 = vmatpush1.bf16.msk.msra.mxu1 %vm944_vm8, %v834_v18 }
  0x96   : > { %845 = vmatprep.subr.msk.bf16.mxu0 %vm944_vm8, %v831_v15  ;;  %824 = vmatprep.subr.msk.mxu1 %vm306_vm6, %v268_v3 }
  0x98   : > { %815 = vmatmul.mubr.msk.f32.vlgmr.msra.gmra.mrb[0].mxu0 %vm302_vm9, %v301_v19  ;;  %820 = vmatmul.mubr.msk.f32.vlgmr.msra.gmra.mrb[0].mxu1 %vm302_vm9, %v817_v20  ;;  %v605_v34 = vpop.permute.xlu0 %604 }
  0x99   : > { %848 = vmatpush1.bf16.msk.msra.mxu0 %vm944_vm8, %v834_v18  ;;  %592 = vmatprep.mubr.f32.mxu0 %v877_v0 }
  0x9a   : > { %825 = vmatpush1.msk.msra.mxu1 %vm306_vm6, %v263_v1  ;;  %686 = vmatprep.mubr.f32.mxu1 %v877_v0 }
  0x9c   : > { %823 = vmatmul.mubr.msk.f32.vlgmr.msra.gmra.mrb[2].mxu0 %vm302_vm9, %v816_v21  ;;  %826 = vmatmul.mubr.msk.f32.vlgmr.msra.gmra.mrb[2].mxu1 %vm614_vm10, %v609_v22 }
 0x16b   : > { %v379_v24 = vpop.f32.mrb[0].mxu0  ;;  %v457_v25 = vpop.f32.mrb[0].mxu1 }
 0x16c   : > { %496 = vrot.lane.b32.xlu1 %v457_v25, %s883_s15  ;;  %v459_v26 = vpop.f32.mrb[1].mxu1  ;;  %464 = vrot.lane.b32.xlu0 %v379_v24, %s884_s16  ;;  %v381_v27 = vpop.f32.mrb[1].mxu0 }
 0x16f   : > { %v594_v28 = vpop.f32.mrb[2].mxu0  ;;  %v688_v29 = vpop.f32.mrb[2].mxu1 }
 0x170   : > { %611 = vperm.xlu0 %866, %v601_v4   ;;  %466 = vrot.lane.b32.xlu1 %v381_v27, %s884_s16  ;;  %v596_v30 = vpop.f32.mrb[3].mxu0  ;;  %v690_v31 = vpop.f32.mrb[3].mxu1 }
 0x174   : > { %498 = vrot.lane.b32.xlu1 %v459_v26, %s883_s15 }
 0x1de   : > { %v497_v42 = vpop.permute.xlu1 %496  ;;  %v465_v43 = vpop.permute.xlu0 %464 }
 0x1df   : > { %v472_v48 = vsel %vm468_vm11, 0.0, %v465_v43 }
 0x1e0   : > { %v492_v51 = vmul.f32 %v487_v44, %v472_v48 }
 0x1e2   : > { %v467_v49 = vpop.permute.xlu1 %466  ;;  %v595_v58 = vadd.f32 %v594_v28, %v492_v51 }
 0x1e3   : > { %v469_v50 = vsel %vm468_vm11, %v465_v43, %v467_v49 }
 0x1e4   : > { %v493_v52 = vmul.f32 %v491_v45, %v469_v50 }
 0x1e6   : > { %v499_v55 = vpop.permute.xlu1 %498  ;;  %v597_v59 = vadd.f32 %v596_v30, %v493_v52 }
 0x1e7   : > { %v501_v56 = vsel %vm500_vm12, %v497_v42, %v499_v55  ;;  %v504_v57 = vsel %vm500_vm12, %v499_v55, 0.0 }
 0x1e8   : > { %v523_v60 = vmul.f32 %v518_v53, %v501_v56  ;;  %v524_v61 = vmul.f32 %v522_v54, %v504_v57 }
 0x1ea   : > { %v599_v62 = vadd.f32 %v595_v58, %v523_v60  ;;  %v600_v63 = vadd.f32 %v597_v59, %v524_v61 }
 0x1ec   : > { %v607_v0 = vadd.f32 %v605_v34, %v599_v62  ;;  %v608_v1 = vadd.f32 %v605_v34, %v600_v63 }
 0x1ee   : > { %v693_v2 = vadd.f32 %v608_v1, %v607_v0  ;;  %715 = vst [vmem:[%s258_s25] sm:$0xff] %v607_v0  ;;  %716 = vst [vmem:[%s258_s25 + $0x8] sm:$0xff] %v608_v1  ;;  %v696_v3 = vmul.f32 %v607_v0, %v607_v0  ;;  %v697_v4 = vmul.f32 %v608_v1, %v608_v1 }
 0x1ef   : > { %v612_v5 = vpop.permute.xlu0 %611 }
 0x1f0   : > { %v689_v6 = vadd.f32 %v688_v29, %v612_v5  ;;  %v691_v7 = vadd.f32 %v690_v31, %v612_v5  ;;  %694 = vadd.xlane.f32.xlu1 %v693_v2  ;;  %v698_v8 = vadd.f32 %v697_v4, %v696_v3 }
 0x1f2   : > { %699 = vadd.xlane.f32.xlu0 %v698_v8  ;;  %v701_v9 = vadd.f32 %v691_v7, %v689_v6  ;;  %v704_v10 = vmul.f32 %v689_v6, %v689_v6  ;;  %v705_v11 = vmul.f32 %v691_v7, %v691_v7 }
 0x1f4   : > { %702 = vadd.xlane.f32.xlu1 %v701_v9  ;;  %v706_v12 = vadd.f32 %v705_v11, %v704_v10 }
 0x1f6   : > { %707 = vadd.xlane.f32.xlu0 %v706_v12 }
 0x27d   : > { %v695_v13 = vpop.xlane.xlu1 %694 }
 0x27f   : > { %v700_v14 = vpop.xlane.xlu0 %699 }
 0x280   : > { %v709_v15 = vsel %vm468_vm11, %v695_v13, %v700_v14 }
 0x281   : > { %v703_v16 = vpop.xlane.xlu1 %702 }
 0x282   : > { %v711_v17 = vsel %vm710_vm13, %v709_v15, %v703_v16 }
 0x283   : > { %v708_v18 = vpop.xlane.xlu0 %707 }
 0x284   : > { %v713_v19 = vsel %vm712_vm14, %v711_v17, %v708_v18 }
 0x285   : > { %714 = vst.msk [vmem:[%s262_s28] sm:$0xff] %vm614_vm10, %v713_v19 }
 0x286 PF: > { %s17_s21 = sadd.s32 1, %s875_s21  }
 0x287   : > { %p14_p4 = scmp.ge.s32.totalorder %s17_s21, 4  }
 0x289   :  { %16 = sbr.rel (!%p14_p4) target bundleno = 1 (0x1), region = 84 }

// kernel: conv_block.5
= control target key start
LH: loop header
LB: loop body
LE: loop exit
PB: predicated region body
PF: predicated region fallthrough
CT: control target
= control target key end

     0   :  { %s460_s15 = smov 0   ;;  %s490_s0 = inlined_call_operand.vmem [shape: f32[2,8,256], index: 0, kind: input, shape index: {}, may-alias: {0,4}]   ;;  %s491_s1 = inlined_call_operand.vmem [shape: f32[2,4,256], index: 1, kind: input, shape index: {}]   ;;  %s492_s2 = inlined_call_operand.vmem [shape: f32[8,4], index: 2, kind: input, shape index: {}]   ;;  %s493_s3 = inlined_call_operand.vmem [shape: f32[8,2], index: 3, kind: input, shape index: {}]   ;;  %s494_s4 = inlined_call_operand.vmem [shape: f32[2,8,256], index: 4, kind: output, shape index: {}, may-alias: {0,4}]  }
   0x1 LB: > { %s391_s16 = sadd.s32 4294967295, %s430_s15   ;;  %p395_p0 = scmp.ge.s32.totalorder %s430_s15, 1  ;;  %s430_s15 = sphi %s460_s15, %s14_s15  }
   0x2   : > { %p172_p1 = scmp.lt.s32.totalorder %s430_s15, 3 }
   0x4   : > { %p173_p2 = pnand %p395_p0, %p172_p1 }
   0x5   : > { %p203_p3 = scmp.lt.s32.totalorder (!%p173_p2), %s391_s16, 1  ;;  %v432_v0 = vmov (!%p173_p2), 0.0   ;;  %v433_v1 = vmov (!%p173_p2), 0   ;;  %v218_v2 = vld [vmem:[%s493_s3] sm:$0xff] (!%p173_p2)  ;;  %vm227_vm0 = vcmask (!%p173_p2), 1043456   ;;  %v434_v4 = vmov (!%p173_p2), 1  }
   0x6   : > { %176 = sbr.rel (%p173_p2) target bundleno = 241 (0xf1), region = 36  ;;  %296 = vmatprep.mubr.f32.mxu0 (!%p173_p2), %v432_v0  ;;  %421 = vset.pattern.permute.xlu0 (!%p173_p2), %v433_v1  ;;  %v219_v6 = vld [vmem:[%s492_s2] sm:$0xff] (!%p173_p2)  ;;  %vm223_vm1 = vcmask (!%p173_p2), 31744  }
   0x7   : > { %307 = vperm.xlu0 (!%p173_p2), %421, %v218_v2  }
   0xb   : > { %422 = vset.pattern.permute.xlu0 (!%p173_p2), %v434_v4 }
   0xc   : > { %315 = vperm.xlu0 (!%p173_p2), %422, %v218_v2  }
   0xd   : > { %s496_s16 = smov (!%p203_p3, %s391_s16), 1 }
   0xe   : > { %s408_s19 = sshll.u32 %s496_s16, 3  ;;  %s407_s25 = sshll.u32 %s496_s16, 4 }
   0xf   : > { %s212_s22 = scalar_lea.vmem %s491_s1, %s408_s19  ;;  %s207_s28 = scalar_lea.vmem %s490_s0, %s407_s25 }
  0x10   : > { %v220_v3 = vld [vmem:[%s212_s22] sm:$0xff]  ;;  %v304_v9 = vld [vmem:[%s207_s28 + $0x8] sm:$0xff]  ;;  %s217_s5 = scalar_lea.vmem %s494_s4, %s407_s25 }
  0x11   : > { %v222_v5 = vcombine.high %v220_v3, %v220_v3  ;;  %v303_v8 = vld [vmem:[%s207_s28] sm:$0xff] }
  0x13   : > { %402 = vmatprep.subr.msk.mxu0 %vm227_vm0, %v222_v5 }
  0x14   : > { %403 = vmatpush1.msk.msra.mxu0 %vm227_vm0, %v220_v3 }
  0x15   : > { %404 = vmatmul.mubr.msk.f32.vlgmr.msra.gmra.mrb[0].mxu0 %vm223_vm1, %v219_v6 }
  0x86   : > { %v308_v7 = vpop.permute.xlu0 %307 }
  0x87   : > { %v310_v10 = vmul.f32 %v308_v7, %v303_v8  ;;  %v311_v11 = vmul.f32 %v308_v7, %v304_v9 }
  0x8b   : > { %v316_v13 = vpop.permute.xlu0 %315 }
  0xe8   : > { %v298_v12 = vpop.f32.mrb[0].mxu0 }
  0xe9   : > { %v312_v14 = vadd.f32 %v310_v10, %v298_v12  ;;  %v300_v15 = vpop.f32.mrb[1].mxu0 }
  0xea   : > { %v313_v16 = vadd.f32 %v311_v11, %v300_v15 }
  0xeb   : > { %v318_v17 = vadd.f32 %v316_v13, %v312_v14 }
  0xec   : > { %v319_v18 = vadd.f32 %v316_v13, %v313_v16 }
  0xed   : > { %v320_v19 = vmax.f32 %v318_v17, 0.0 }
  0xee   : > { %v321_v20 = vmax.f32 %v319_v18, 0.0 }
  0xef   : > { %322 = vst [vmem:[%s217_s5] sm:$0xff] %v320_v19 }
  0xf0   : > { %323 = vst [vmem:[%s217_s5 + $0x8] sm:$0xff] %v321_v20 }
  0xf1 PF: > { %s14_s15 = sadd.s32 1, %s430_s15  }
  0xf2   : > { %p11_p4 = scmp.ge.s32.totalorder %s14_s15, 4  }
  0xf4   :  { %13 = sbr.rel (!%p11_p4) target bundleno = 1 (0x1), region = 69 }

// kernel: conv_block.4
= control target key start
LH: loop header
LB: loop body
LE: loop exit
PB: predicated region body
PF: predicated region fallthrough
CT: control target
= control target key end

     0   :  { %s784_s18 = smov 0   ;;  %s832_s0 = inlined_call_operand.vmem [shape: f32[2,8,256], index: 0, kind: input, shape index: {}]   ;;  %s833_s1 = inlined_call_operand.vmem [shape: f32[3,8,24], index: 1, kind: input, shape index: {}]   ;;  %s834_s2 = inlined_call_operand.vmem [shape: f32[8,3], index: 2, kind: input, shape index: {}]   ;;  %s835_s3 = inlined_call_operand.vmem [shape: f32[2,256], index: 3, kind: input, shape index: {}]   ;;  %s836_s4 = inlined_call_operand.vmem [shape: f32[2,8,256], index: 4, kind: output, shape index: {0}]   ;;  %s837_s5 = inlined_call_operand.vmem [shape: f32[2,8,2], index: 5, kind: output, shape index: {1}]  }
   0x1 LB: > { %s687_s19 = sadd.s32 4294967295, %s744_s18   ;;  %p691_p0 = scmp.ge.s32.totalorder %s744_s18, 1  ;;  %s744_s18 = sphi %s784_s18, %s16_s18  }
   0x2   : > { %p190_p1 = scmp.lt.s32.totalorder %s744_s18, 3 }
   0x4   : > { %p191_p2 = pnand %p691_p0, %p190_p1 }
   0x5   : > { %v237_v0 = vld [vmem:[%s834_s2] sm:$0xff] (!%p191_p2)  ;;  %v746_v1 = vmov (!%p191_p2), 0   ;;  %v747_v2 = vmov (!%p191_p2), 1   ;;  %p222_p3 = scmp.lt.s32.totalorder (!%p191_p2), %s687_s19, 1  ;;  %vm255_vm0 = vcmask (!%p191_p2), 130048   ;;  %v748_v3 = vmov (!%p191_p2), 0.0  }
   0x6   : > { %194 = sbr.rel (%p191_p2) target bundleno = 765 (0x2fd), region = 36  ;;  %734 = vset.pattern.permute.xlu0 (!%p191_p2), %v746_v1  ;;  %256 = vst.msk [vmem:[#allocation2] sm:$0xff] (!%p191_p2), %vm255_vm0, %v748_v3  ;;  %358 = vmatprep.mubr.f32.mxu0 (!%p191_p2), %v748_v3  ;;  %s749_s26 = smov (!%p191_p2), 112   ;;  %v751_v14 = vmov (!%p191_p2), 2   ;;  %vm266_vm1 = vcmask (!%p191_p2), 1047680   ;;  %vm275_vm2 = vcmask (!%p191_p2), 916480   ;;  %v455_v34 = vlaneseq (!%p191_p2) }
   0x7   : > { %242 = vperm.xlu0 (!%p191_p2), %734, %v237_v0   ;;  %436 = vmatprep.mubr.f32.mxu1 (!%p191_p2), %v748_v3  ;;  %s750_s27 = smov (!%p191_p2), 16   ;;  %vm281_vm3 = vcmask (!%p191_p2), 1048448   ;;  %v289_v25 = vld [vmem:[%s833_s1] sm:$0xff] (!%p191_p2)  ;;  %vm290_vm4 = vcmask (!%p191_p2), 195584   ;;  %v699_v26 = vld [vmem:[%s833_s1 + $0x10] sm:$0xff] (!%p191_p2)  ;;  %v698_v27 = vld [vmem:[%s833_s1 + $0x8] sm:$0xff] (!%p191_p2) }
   0x8   : > { %736 = vset.pattern.permute.xlu1 (!%p191_p2), %v751_v14  ;;  %s752_s9 = smov (!%p191_p2), 1   ;;  %s753_s10 = smov (!%p191_p2), 127   ;;  %v456_v35 = vshrl.u32 (!%p191_p2), %v455_v34, 7  ;;  %v236_v38 = vld [vmem:[%s835_s3] sm:$0xf] (!%p191_p2)  ;;  %vm449_vm5 = vcmask (!%p191_p2), 7168  }
   0x9   : > { %vm481_vm6 = vcmask (!%p191_p2), 1039360   ;;  %vm597_vm7 = vcmask (!%p191_p2), 15360  }
   0xa   : > { %v457_v36 = vsub.s32 (!%p191_p2), 0, %v456_v35  ;;  %v461_v37 = vsub.s32 (!%p191_p2), 2, %v456_v35  ;;  %v492_v40 = vsub.s32 (!%p191_p2), 3, %v456_v35  ;;  %v488_v42 = vsub.s32 (!%p191_p2), 1, %v456_v35 }
   0xb   : > { %735 = vset.pattern.permute.xlu0 (!%p191_p2), %v747_v2 }
   0xc   : > { %248 = vperm.xlu0 (!%p191_p2), %735, %v237_v0   ;;  %v458_v41 = vrot.slane (!%p191_p2), %v236_v38, %v457_v36  ;;  %v462_v43 = vrot.slane (!%p191_p2), %v236_v38, %v461_v37  ;;  %v493_v44 = vrot.slane (!%p191_p2), %v236_v38, %v492_v40  ;;  %v489_v47 = vrot.slane (!%p191_p2), %v236_v38, %v488_v42 }
   0xd   : > { %s839_s19 = smov (!%p222_p3, %s687_s19), 1 }
   0xe   : > { %s704_s22 = sshll.u32 %s839_s19, 4  ;;  %v468_v45 = vrot.slane %v458_v41, %v457_v36  ;;  %v472_v46 = vrot.slane %v462_v43, %v457_v36  ;;  %v503_v52 = vrot.slane %v493_v44, %v488_v42  ;;  %v499_v55 = vrot.slane %v489_v47, %v488_v42  ;;  %s696_s16 = sshll.u32 %s839_s19, 3 }
   0xf   : > { %s226_s25 = scalar_lea.vmem %s832_s0, %s704_s22  ;;  %s231_s15 = scalar_lea.vmem %s836_s4, %s704_s22 }
  0x10   : > { %v238_v5 = vld [vmem:[%s226_s25] sm:$0xff]  ;;  %v239_v6 = vld [vmem:[%s226_s25 + $0x8] sm:$0xff]  ;;  %737 = vset.pattern.permute.xlu0 %v751_v14  ;;  %s235_s21 = scalar_lea.vmem %s837_s5, %s696_s16 }
  0x86   : > { %v243_v4 = vpop.permute.xlu0 %242 }
  0x87   : > { %v245_v7 = vmul.f32 %v243_v4, %v238_v5  ;;  %v246_v8 = vmul.f32 %v243_v4, %v239_v6 }
  0x8b   : > { %v249_v9 = vpop.permute.xlu0 %248 }
  0x8c   : > { %v251_v10 = vadd.f32 %v249_v9, %v245_v7  ;;  %v252_v11 = vadd.f32 %v249_v9, %v246_v8 }
  0x8e   : > { %v253_v12 = vmax.f32 %v251_v10, 0.0  ;;  %v254_v13 = vmax.f32 %v252_v11, 0.0 }
  0x90   : > { %271 = vrot.lane.b32.xlu0 %v253_v12, %s749_s26  ;;  %259 = vrot.lane.b32.xlu1 %v253_v12, %s750_s27 }
  0x94   : > { %261 = vrot.lane.b32.xlu1 %v254_v13, %s750_s27 }
  0x98   : > { %273 = vrot.lane.b32.xlu1 %v254_v13, %s749_s26 }
  0x9c   : > { %583 = vperm.xlu1 %736, %v237_v0  }
 0x102   : > { %v260_v15 = vpop.permute.xlu1 %259  ;;  %v272_v19 = vpop.permute.xlu0 %271 }
 0x103   : > { %267 = vst.msk [vmem:[#allocation2] sm:$0xff] %vm266_vm1, %v260_v15 }
 0x106   : > { %v262_v16 = vpop.permute.xlu1 %261 }
 0x107   : > { %v263_v17 = vsel %vm255_vm0, %v260_v15, %v262_v16 }
 0x108   : > { %v706_v18 = vpack.c.bf16 %v254_v13, %v263_v17 }
 0x10a   : > { %v274_v20 = vpop.permute.xlu1 %273  ;;  %707 = vmatprep.subr.bf16.mxu0 %v706_v18  ;;  %711 = vmatprep.subr.bf16.mxu1 %v706_v18  ;;  %v283_v21 = vld [vmem:[#allocation2] sm:$0xff] }
 0x10b   : > { %v276_v22 = vsel %vm275_vm2, %v272_v19, %v274_v20  ;;  %280 = vst.msk [vmem:[#allocation2 + $0x28] sm:$0xff] %vm275_vm2, %v274_v20  ;;  %v708_v23 = vpack.c.bf16 %v253_v12, %v283_v21 }
 0x10c   : > { %282 = vst.msk [vmem:[#allocation2 + $0x28] sm:$0xff] %vm281_vm3, %v748_v3 }
 0x10d   : > { %709 = vmatpush1.bf16.msra.mxu0 %v708_v23  ;;  %713 = vmatpush1.bf16.msra.mxu1 %v708_v23 }
 0x113   : > { %v288_v24 = vld [vmem:[#allocation2 + $0x28] sm:$0xff] }
 0x114   : > { %298 = vmatprep.subr.mxu0 %v288_v24  ;;  %376 = vmatprep.subr.mxu1 %v288_v24 }
 0x115   : > { %299 = vmatpush1.msra.mxu0 %v276_v22  ;;  %377 = vmatpush1.msra.mxu1 %v276_v22 }
 0x116   : > { %697 = vmatmul.mubr.msk.f32.vlgmr.msra.gmra.mrb[0].mxu0 %vm290_vm4, %v289_v25  ;;  %715 = vmatprep.subr.bf16.mxu0 %v706_v18 }
 0x117   : > { %717 = vmatpush1.bf16.msra.mxu0 %v708_v23  ;;  %700 = vmatmul.mubr.msk.f32.vlgmr.msra.gmra.mrb[0].mxu1 %vm290_vm4, %v699_v26 }
 0x118   : > { %513 = vmatprep.subr.mxu0 %v288_v24  ;;  %573 = vmatprep.mubr.f32.mxu0 %v748_v3 }
 0x11b   : > { %514 = vmatpush1.msra.mxu0 %v276_v22  ;;  %v584_v39 = vpop.permute.xlu1 %583 }
 0x11c   : > { %701 = vmatmul.mubr.msk.f32.vlgmr.msra.gmra.mrb[2].mxu0 %vm290_vm4, %v698_v27 }
 0x1e9   : > { %v360_v28 = vpop.f32.mrb[0].mxu0 }
 0x1ea   : > { %445 = vrot.lane.b32.xlu1 %v360_v28, %s752_s9  ;;  %v362_v29 = vpop.f32.mrb[1].mxu0  ;;  %v438_v30 = vpop.f32.mrb[0].mxu1 }
 0x1eb   : > { %447 = vrot.lane.b32.xlu0 %v362_v29, %s752_s9  ;;  %v440_v31 = vpop.f32.mrb[1].mxu1 }
 0x1ee   : > { %479 = vrot.lane.b32.xlu1 %v440_v31, %s753_s10 }
 0x1ef   : > { %477 = vrot.lane.b32.xlu0 %v438_v30, %s753_s10  ;;  %v575_v32 = vpop.f32.mrb[2].mxu0 }
 0x1f0   : > { %v577_v33 = vpop.f32.mrb[3].mxu0 }
 0x25c   : > { %v446_v48 = vpop.permute.xlu1 %445 }
 0x25d   : > { %v453_v49 = vsel %vm449_vm5, 0.0, %v446_v48  ;;  %v448_v50 = vpop.permute.xlu0 %447 }
 0x25e   : > { %v450_v51 = vsel %vm449_vm5, %v446_v48, %v448_v50  ;;  %v473_v53 = vmul.f32 %v468_v45, %v453_v49 }
 0x25f   : > { %v474_v54 = vmul.f32 %v472_v46, %v450_v51 }
 0x260   : > { %v480_v56 = vpop.permute.xlu1 %479  ;;  %v576_v62 = vadd.f32 %v575_v32, %v473_v53 }
 0x261   : > { %v485_v57 = vsel %vm481_vm6, %v480_v56, 0.0  ;;  %v578_v58 = vadd.f32 %v577_v33, %v474_v54  ;;  %v478_v59 = vpop.permute.xlu0 %477 }
 0x262   : > { %v505_v60 = vmul.f32 %v503_v52, %v485_v57  ;;  %v482_v61 = vsel %vm481_vm6, %v478_v59, %v480_v56 }
 0x263   : > { %v504_v63 = vmul.f32 %v499_v55, %v482_v61 }
 0x264   : > { %v581_v0 = vadd.f32 %v578_v58, %v505_v60 }
 0x265   : > { %v580_v1 = vadd.f32 %v576_v62, %v504_v63 }
 0x266   : > { %v587_v2 = vadd.f32 %v584_v39, %v581_v0 }
 0x267   : > { %v586_v3 = vadd.f32 %v584_v39, %v580_v1 }
 0x268   : > { %600 = vst [vmem:[%s231_s15 + $0x8] sm:$0xff] %v587_v2  ;;  %v592_v4 = vmul.f32 %v587_v2, %v587_v2 }
 0x269   : > { %v588_v5 = vadd.f32 %v587_v2, %v586_v3  ;;  %599 = vst [vmem:[%s231_s15] sm:$0xff] %v586_v3  ;;  %v591_v6 = vmul.f32 %v586_v3, %v586_v3 }
 0x26b   : > { %589 = vadd.xlane.f32.xlu0 %v588_v5  ;;  %v593_v7 = vadd.f32 %v592_v4, %v591_v6 }
 0x26d   : > { %594 = vadd.xlane.f32.xlu1 %v593_v7 }
 0x2f8   : > { %v590_v8 = vpop.xlane.xlu0 %589 }
 0x2fa   : > { %v595_v9 = vpop.xlane.xlu1 %594 }
 0x2fb   : > { %v596_v10 = vsel %vm449_vm5, %v590_v8, %v595_v9 }
 0x2fc   : > { %598 = vst.msk [vmem:[%s235_s21] sm:$0xff] %vm597_vm7, %v596_v10 }
 0x2fd PF: > { %s16_s18 = sadd.s32 1, %s744_s18  }
 0x2fe   : > { %p13_p4 = scmp.ge.s32.totalorder %s16_s18, 4  }
 0x300   :  { %15 = sbr.rel (!%p13_p4) target bundleno = 1 (0x1), region = 80 }

</bundles_post_ra>
